<compile_context>
chip_gen: v7x
topology: tpu7x:2x2x1
jax: 0.10.0
libtpu: 0.0.40
codegen_flags: <defaults>
</compile_context>

<pallas_src>
import functools
import math

import jax
import jax.numpy as jnp
from jax.experimental import pallas as pl
from jax.experimental.pallas import tpu as pltpu

_SUBLANE = 8  # vreg sublane granularity (rows)


def _round_up(x: int, m: int) -> int:
    return pl.cdiv(x, m) * m


def _choose_tiling(B: int, block_b: int):
    """Pick (tile_rows, padded_rows) for the batch axis.

    Goals (perf review):
      * tiles divide B as evenly as possible (minimal padding / wasted DMA),
      * even grid length >= 4 when B spans multiple tiles, so v7x's two
        TensorCores each get a balanced, software-pipelined loop,
      * tile rows are a multiple of the 8-row sublane granularity.
    """
    B8 = _round_up(max(B, 1), _SUBLANE)
    block_b = max(_round_up(block_b, _SUBLANE), _SUBLANE)
    n_tiles = pl.cdiv(B8, block_b)
    if n_tiles > 1:
        # Even and >= 4 steps: both cores busy, each with prefetch overlap.
        n_tiles = max(_round_up(n_tiles, 2), 4)
    tb = min(_round_up(pl.cdiv(B8, n_tiles), _SUBLANE), block_b)
    n_tiles = pl.cdiv(B8, tb)
    return tb, n_tiles * tb


def _prob_net_kernel(x_ref, w_ref, b_ref, o_ref):
    # x_ref: [TB, Cin] (native dtype -> bf16 or f32 MXU path, f32 accumulate)
    # w_ref: [Cin, Cout]  resident across grid steps (index_map always (0,0))
    # b_ref: [1, Cout]    f32, resident
    # o_ref: [TB, Cout]   un-padded output (masked store, 8x less HBM traffic)
    logits = jnp.dot(x_ref[...], w_ref[...], preferred_element_type=jnp.float32)
    logits = logits + b_ref[...]                      # [TB, Cout], f32

    # Numerically stable log_softmax along the last axis, all in f32.
    m = jnp.max(logits, axis=-1, keepdims=True)
    shifted = logits - m
    lse = jnp.log(jnp.sum(jnp.exp(shifted), axis=-1, keepdims=True))
    o_ref[...] = (shifted - lse).astype(o_ref.dtype)


@functools.partial(
    jax.jit, static_argnames=("block_b", "out_dtype", "xla_fallback_rows"))
def prob_network_forward(x, w_t, b, *, block_b: int = 1024,
                         out_dtype=jnp.float32, xla_fallback_rows: int = 0):
    """Forward pass of Prob_Network.

    x:   [..., Cin] activations (any leading dims, like nn.Linear)
    w_t: [Cin, Cout] pre-transposed nn.Linear weight
    b:   [Cout] bias
    Returns [..., Cout] log-probabilities in `out_dtype`.
    """
    *lead, Cin = x.shape
    Cin_w, Cout = w_t.shape
    assert Cin == Cin_w, "weight/input feature mismatch"
    B = math.prod(lead) if lead else 1
    x2 = x.reshape(B, Cin)

    # Keep matmul operands in one dtype so bf16 activations hit the native
    # bf16 MXU path (mixed bf16 x f32 would silently promote to f32 passes).
    w_mat = w_t if w_t.dtype == x2.dtype else w_t.astype(x2.dtype)
    b2 = b.astype(jnp.float32).reshape(1, Cout)

    # Tiny batches: launch overhead dwarfs the work — let XLA fuse it instead.
    if B <= xla_fallback_rows:
        logits = (x2.astype(jnp.float32) @ w_t.astype(jnp.float32)
                  + b.astype(jnp.float32))
        out = jax.nn.log_softmax(logits, axis=-1).astype(out_dtype)
        return out.reshape(*lead, Cout)

    # --- batch tiling: balanced tiles, even grid (>=4) for v7x megacore ----
    TB, B_pad = _choose_tiling(B, block_b)
    x_p = jnp.pad(x2, ((0, B_pad - B), (0, 0))) if B_pad != B else x2
    grid = (B_pad // TB,)

    # --- VMEM budget: true double-buffered footprint, 2x headroom ----------
    x_isz = jnp.dtype(x2.dtype).itemsize
    w_isz = jnp.dtype(w_mat.dtype).itemsize
    o_isz = jnp.dtype(out_dtype).itemsize
    tile_bytes = 2 * (TB * Cin * x_isz        # x tile (double buffered)
                      + TB * Cout * o_isz     # out tile
                      + Cin * Cout * w_isz    # resident weight (still 2-buffered)
                      + Cout * 4)             # resident bias
    vmem_limit = int(min(max(2 * tile_bytes, 16 << 20), 48 << 20))

    cost = pl.CostEstimate(
        flops=2 * B_pad * Cin * Cout,
        transcendentals=B_pad * (Cout + 1),   # exp per logit + log per row
        bytes_accessed=(B_pad * Cin * x_isz + Cin * Cout * w_isz
                        + Cout * 4 + B_pad * Cout * o_isz),
    )

    out = pl.pallas_call(
        _prob_net_kernel,
        out_shape=jax.ShapeDtypeStruct((B_pad, Cout), out_dtype),
        grid=grid,
        in_specs=[
            pl.BlockSpec((TB, Cin), lambda i: (i, 0)),      # x tile per step
            pl.BlockSpec((Cin, Cout), lambda i: (0, 0)),    # weight, resident
            pl.BlockSpec((1, Cout), lambda i: (0, 0)),      # bias, resident
        ],
        out_specs=pl.BlockSpec((TB, Cout), lambda i: (i, 0)),
        compiler_params=pltpu.CompilerParams(
            dimension_semantics=("parallel",),
            vmem_limit_bytes=vmem_limit,
        ),
        cost_estimate=cost,
    )(x_p, w_mat, b2)

    out = out[:B] if B_pad != B else out
    return out.reshape(*lead, Cout)


def _reference_forward(x, w_t, b):
    logits = (x.astype(jnp.float32) @ w_t.astype(jnp.float32)
              + b.astype(jnp.float32))
    return jax.nn.log_softmax(logits, axis=-1)


if __name__ == "__main__":
    # Module config: in_channels=32, hidden_channels=64 (unused by forward),
    # out_channels=16; batch=8.
    in_channels, hidden_channels, out_channels = 32, 64, 16
    batch = 8

    key = jax.random.PRNGKey(0)
    kx, kw, kb = jax.random.split(key, 3)

    # nn.Linear-style init: uniform(-1/sqrt(fan_in), 1/sqrt(fan_in)).
    bound = 1.0 / (in_channels ** 0.5)
    # PyTorch stores weight as [out, in]; kernel takes the transposed [in, out].
    w_t = jax.random.uniform(kw, (in_channels, out_channels),
                             minval=-bound, maxval=bound, dtype=jnp.float32)
    b = jax.random.uniform(kb, (out_channels,),
                           minval=-bound, maxval=bound, dtype=jnp.float32)
    x = jax.random.normal(kx, (batch, in_channels), dtype=jnp.float32)

    out = jax.block_until_ready(prob_network_forward(x, w_t, b))
    ref = _reference_forward(x, w_t, b)
    assert out.shape == (batch, out_channels)
    assert jnp.allclose(out, ref, atol=1e-5, rtol=1e-5), "mismatch vs reference"
    # log-probs must exponentiate-sum to 1 along the last dim.
    assert jnp.allclose(jnp.sum(jnp.exp(out), axis=-1), 1.0, atol=1e-5)

    # Secondary check: multi-tile, even (>=4) grid with minimal batch padding
    # (B=300, block_b=128 -> 4 tiles of 80 rows, 20 padded rows).
    x2 = jax.random.normal(jax.random.PRNGKey(1), (300, in_channels), jnp.float32)
    out2 = jax.block_until_ready(prob_network_forward(x2, w_t, b, block_b=128))
    ref2 = _reference_forward(x2, w_t, b)
    assert out2.shape == (300, out_channels)
    assert jnp.allclose(out2, ref2, atol=1e-5, rtol=1e-5), "tiled mismatch"

    # Third check: bf16 activations stay on the bf16 MXU path (weight is cast
    # inside the wrapper); compare against the f32 reference of the rounded
    # operands.
    x3 = jax.random.normal(jax.random.PRNGKey(2), (64, in_channels),
                           jnp.float32).astype(jnp.bfloat16)
    out3 = jax.block_until_ready(prob_network_forward(x3, w_t, b))
    ref3 = _reference_forward(x3.astype(jnp.float32),
                              w_t.astype(jnp.bfloat16).astype(jnp.float32), b)
    assert out3.shape == (64, out_channels)
    assert jnp.allclose(out3, ref3, atol=2e-2, rtol=2e-2), "bf16 mismatch"

    print("KERNEL_OK")
</pallas_src>

<mosaic_0001>
module attributes {stable_mosaic.version = 11 : i64} {
  func.func @_prob_net_kernel(%arg0: i32, %arg1: memref<8x32xf32, #tpu.memory_space<vmem>>, %arg2: memref<32x16xf32, #tpu.memory_space<vmem>>, %arg3: memref<1x16xf32, #tpu.memory_space<vmem>>, %arg4: memref<8x16xf32, #tpu.memory_space<vmem>>) attributes {dimension_semantics = [#tpu.dimension_semantics<parallel>], iteration_bounds = array<i64: 1>, scalar_prefetch = 0 : i64, scratch_operands = 0 : i64, tpu.core_type = #tpu.core_type<tc>, window_params = [{transform_indices = @transform_0, window_bounds = array<i64: 8, 32>}, {pipeline_mode = #tpu.pipeline_mode<synchronous>, transform_indices = @transform_1, window_bounds = array<i64: 32, 16>}, {pipeline_mode = #tpu.pipeline_mode<synchronous>, transform_indices = @transform_2, window_bounds = array<i64: 1, 16>}, {transform_indices = @transform_3, window_bounds = array<i64: 8, 16>}]} {
    %c0 = arith.constant 0 : index
    %c0_0 = arith.constant 0 : index
    %0 = vector.load %arg1[%c0, %c0_0] : memref<8x32xf32, #tpu.memory_space<vmem>>, vector<8x32xf32>
    %c0_1 = arith.constant 0 : index
    %c0_2 = arith.constant 0 : index
    %1 = vector.load %arg2[%c0_1, %c0_2] : memref<32x16xf32, #tpu.memory_space<vmem>>, vector<32x16xf32>
    %cst = arith.constant dense<0.000000e+00> : vector<8x16xf32>
    %2 = tpu.matmul %0, %1, %cst {dimension_numbers = #tpu.dot_dimension_numbers<[1], [0], [0], [1], [0, 0, 1, 1], [], []>} : vector<8x32xf32>, vector<32x16xf32>, vector<8x16xf32> -> vector<8x16xf32>
    %c0_3 = arith.constant 0 : index
    %c0_4 = arith.constant 0 : index
    %3 = vector.load %arg3[%c0_3, %c0_4] : memref<1x16xf32, #tpu.memory_space<vmem>>, vector<1x16xf32>
    %4 = vector.broadcast %3 : vector<1x16xf32> to vector<8x16xf32>
    %5 = arith.addf %2, %4 : vector<8x16xf32>
    %cst_5 = arith.constant dense<0xFF800000> : vector<8xf32>
    %6 = vector.multi_reduction <maximumf>, %5, %cst_5 [1] : vector<8x16xf32> to vector<8xf32>
    %7 = vector.shape_cast %6 : vector<8xf32> to vector<8x1xf32>
    %8 = vector.broadcast %7 : vector<8x1xf32> to vector<8x16xf32>
    %9 = arith.subf %5, %8 : vector<8x16xf32>
    %10 = math.exp %9 : vector<8x16xf32>
    %cst_6 = arith.constant dense<0.000000e+00> : vector<8xf32>
    %11 = vector.multi_reduction <add>, %10, %cst_6 [1] : vector<8x16xf32> to vector<8xf32>
    %12 = vector.shape_cast %11 : vector<8xf32> to vector<8x1xf32>
    %13 = math.log %12 : vector<8x1xf32>
    %14 = vector.broadcast %13 : vector<8x1xf32> to vector<8x16xf32>
    %15 = arith.subf %9, %14 : vector<8x16xf32>
    %c0_7 = arith.constant 0 : index
    %c0_8 = arith.constant 0 : index
    %16 = vector.load %arg4[%c0_7, %c0_8] : memref<8x16xf32, #tpu.memory_space<vmem>>, vector<8x16xf32>
    tpu.vector_store %arg4[%c0_7, %c0_8], %15 {strides = array<i32>} : memref<8x16xf32, #tpu.memory_space<vmem>>, vector<8x16xf32>,
    return
  }
  func.func @transform_0(%arg0: i32) -> (i32, i32) {
    %c0_i32 = arith.constant 0 : i32
    %c0_i32_0 = arith.constant 0 : i32
    return %arg0, %c0_i32 : i32, i32
  }
  func.func @transform_1(%arg0: i32) -> (i32, i32) {
    %c0_i32 = arith.constant 0 : i32
    %c0_i32_0 = arith.constant 0 : i32
    %c0_i32_1 = arith.constant 0 : i32
    return %c0_i32, %c0_i32_0 : i32, i32
  }
  func.func @transform_2(%arg0: i32) -> (i32, i32) {
    %c0_i32 = arith.constant 0 : i32
    %c0_i32_0 = arith.constant 0 : i32
    %c0_i32_1 = arith.constant 0 : i32
    return %c0_i32, %c0_i32_0 : i32, i32
  }
  func.func @transform_3(%arg0: i32) -> (i32, i32) {
    %c0_i32 = arith.constant 0 : i32
    %c0_i32_0 = arith.constant 0 : i32
    return %arg0, %c0_i32 : i32, i32
  }
}

</mosaic_0001>

<bundles_post_ra>
// kernel: prob_network_forward.1
= control target key start
LH: loop header
LB: loop body
LE: loop exit
PB: predicated region body
PF: predicated region fallthrough
CT: control target
= control target key end

     0   :  { %v185_v3 = vmov 0.0|0.0   ;;  %vm186_vm0 = vmmov 0   ;;  %v187_v6 = vmov 0.0   ;;  %s242_s0 = inlined_call_operand.vmem [shape: f32[8,32], index: 0, kind: input, shape index: {}]   ;;  %s243_s1 = inlined_call_operand.vmem [shape: f32[32,16], index: 1, kind: input, shape index: {}]   ;;  %s244_s2 = inlined_call_operand.vmem [shape: f32[1,16], index: 2, kind: input, shape index: {}]   ;;  %s245_s3 = inlined_call_operand.hbm [shape: f32[8,16], index: 3, kind: output, shape index: {}]  }
   0x1   :  { %v16_v0 = vld [vmem:[%s243_s1] sm:$0xff]  ;;  %v17_v1 = vld [vmem:[%s243_s1 + $0x8] sm:$0xff]  ;;  %v18_v2 = vld [vmem:[%s243_s1 + $0x10] sm:$0xff]  ;;  %147 = vmatprep.subr.bf16.mxu0 %v185_v3  ;;  %144 = vmatprep.mubr.msk.f32.mxu0 %vm186_vm0, %v187_v6 }
   0x2   :  { %v148_v4 = vpack.c.bf16 %v17_v1, %v16_v0  ;;  %v19_v5 = vld [vmem:[%s243_s1 + $0x18] sm:$0xff] }
   0x3   :  { %8 = vsyncpa [#allocation3], 0  ;;  %v151_v7 = vpack.c.bf16 %v19_v5, %v18_v2  ;;  %v15_v8 = vld [vmem:[%s242_s0] sm:$0xff]  ;;  %vm27_vm1 = vcmask 261120   ;;  %vm101_vm2 = vcmask 130048   ;;  %s188_s0 = smov [#allocation2]  }
   0x4   :  { %149 = vmatpush3.bf16.msra.mxu0 %v148_v4  ;;  %v129_v9 = vld [vmem:[%s244_s2] ss:$0 sm:$0xff]  ;;  %s121_s1 = sshll.u32 %s188_s0, 4  ;;  %s122_s1 = int_to_ptr.vmem [resolvable:$true] %s121_s1 }
   0x5   :  { %150 = vmatprep.subr.bf16.mxu0 %v185_v3  ;;  %s161_s2 = scalar_lea.vmem %s122_s1, 128  ;;  %p166_p1 = scmp.lt.s32.totalorder %s122_s1, %s122_s1 }
   0x6   :  { %p162_p0 = scmp.ne.s32.totalorder %s122_s1, %s161_s2  ;;  %p167_p2 = scmp.lt.s32.totalorder %s161_s2, %s161_s2 }
   0x8   :  { %152 = vmatpush3.bf16.msra.mxu0 %v151_v7  ;;  %p168_p3 = por %p167_p2, %p166_p1 }
   0xa   :  { %p169_p4 = pnand %p168_p3, %p162_p0 }
   0xb   :  { %145 = vmatmul.mubr.msk.f32.vlgmr.msra.gmra.mrb[0].mxu0 %vm27_vm1, %v15_v8 }
  0xde   :  { %v97_v10 = vpop.f32.mrb[0].mxu0 }
  0xdf   :  { %v98_v11 = vadd.f32 %v129_v9, %v97_v10  ;;  %v146_v12 = vpop.f32.mrb[1].mxu0 }
  0xe1   :  { %v102_v13 = vsel %vm101_vm2, %v98_v11, -inf }
  0xe2   :  { %103 = vmax.xlane.f32.xlu0 %v102_v13 }
 0x16f   :  { %v104_v14 = vpop.xlane.xlu0 %103 }
 0x170   :  { %v105_v15 = vsub.f32 %v98_v11, %v104_v14 }
 0x172   :  { %v106_v16 = vmul.f32 1.442695, %v105_v15 }
 0x174   :  { %157 = vpow2.f32 %v106_v16 }
 0x17e   :  { %v158_v17 = vpop.eup %157 }
 0x17f   :  { %v108_v18 = vsel %vm101_vm2, %v158_v17, 0.0 }
 0x180   :  { %109 = vadd.xlane.f32.xlu0 %v108_v18 }
 0x20d   :  { %v110_v19 = vpop.xlane.xlu0 %109 }
 0x20e   :  { %159 = vlog2.f32 %v110_v19 }
 0x218   :  { %v160_v20 = vpop.eup %159 }
 0x219   :  { %v112_v21 = vmul.f32 0.6931472, %v160_v20 }
 0x21b   :  { %v113_v22 = vsub.f32 %v105_v15, %v112_v21 }
 0x21d   :  { %114 = vst.msk [vmem:[#allocation2] sm:$0xff] %vm101_vm2, %v113_v22 }
 0x21e   :  { %172 = shalt.err (!%p169_p4)
}
 0x21f   :  { %s173_s26 = scalar_lea.hbm %s245_s3, 128 }
 0x220   :  { %p174_p5 = scmp.ne.s32.totalorder %s245_s3, %s173_s26  ;;  %p177_p6 = scmp.lt.u32.totalorder %s173_s26, %s245_s3 }
 0x222   :  { %p179_p7 = pnand %p177_p6, %p174_p5 }
 0x224   :  { %182 = shalt.err (!%p179_p7)
}
 0x225   :  { %124 = dma.vmem_to_hbm [thread:$0]  %s122_s1, 128, %s245_s3, [#allocation3]  }
 0x226   :  { %183 = dma.done.wait [#allocation3], 128  }
 0x227   :  { %184 = vsyncadd [#allocation3], 4294967168 }
 0x228   :  { %128 = vsyncpa [#allocation3], 1 }

</bundles_post_ra>
